<compile_context>
chip_gen: v5e
topology: v5e:2x2
jax: 0.10.0
libtpu: 0.0.40
codegen_flags: <defaults>
</compile_context>

<pallas_src>
import functools

import jax
import jax.numpy as jnp
from jax.experimental import pallas as pl
from jax.experimental.pallas import tpu as pltpu


def _round_up(n, m):
    return ((n + m - 1) // m) * m


def _apply_dropout(h, bits_ref, mode, thresh, inv_keep):
    """Inverted dropout on an f32 VMEM value.  `mode` is a compile-time string."""
    if mode == "none":          # eval mode or p == 0
        return h
    if mode == "zero":          # p == 1  ->  torch.zeros_like
        return jnp.zeros_like(h)
    # mask = (uniform > p)  <=>  (uint32 bits > p * 2^32); scale by 1/(1-p).
    keep = bits_ref[...] > jnp.uint32(thresh)
    return jnp.where(keep, h * inv_keep, 0.0)


def _mlp_kernel(x_ref, w1_ref, b1_ref, w2_ref, b2_ref, w3_ref, b3_ref,
                bits1_ref, bits2_ref, o_ref, *,
                mode1, thresh1, inv1, mode2, thresh2, inv2):
    x = x_ref[...]

    # fc1 + ReLU (+ dropout1) — MXU in bf16, f32 accumulate, f32 elementwise.
    h1 = jnp.dot(x, w1_ref[...], preferred_element_type=jnp.float32) + b1_ref[...]
    h1 = jnp.maximum(h1, 0.0)
    h1 = _apply_dropout(h1, bits1_ref, mode1, thresh1, inv1)

    # fc2 + ReLU (+ dropout2)
    h2 = jnp.dot(h1.astype(w2_ref.dtype), w2_ref[...],
                 preferred_element_type=jnp.float32) + b2_ref[...]
    h2 = jnp.maximum(h2, 0.0)
    h2 = _apply_dropout(h2, bits2_ref, mode2, thresh2, inv2)

    # fc3
    o_ref[...] = (jnp.dot(h2.astype(w3_ref.dtype), w3_ref[...],
                          preferred_element_type=jnp.float32)
                  + b3_ref[...]).astype(o_ref.dtype)


def dropout_mlp_forward(x, params, *, dropout1, dropout2, training=True, seed=0,
                        compute_dtype=jnp.bfloat16):
    """Forward pass of DropoutMLPScratch.

    x: [B, ...] (flattened to [B, D_in], like x.reshape(B, -1)).
    params: (w1, b1, w2, b2, w3, b3) with wK of shape [in, out], bK of shape [out].
    """
    w1, b1, w2, b2, w3, b3 = params
    B = x.shape[0]
    d_in, h1_dim = w1.shape
    h2_dim = w2.shape[1]
    out_dim = w3.shape[1]

    # Lane-pad feature dims to 128; pick a batch row tile and pad the batch.
    d_in_p = _round_up(d_in, 128)
    h1_p = _round_up(h1_dim, 128)
    h2_p = _round_up(h2_dim, 128)
    out_p = _round_up(out_dim, 128)

    tm = min(256, _round_up(B, 8))
    b_p = _round_up(B, tm)
    num_tiles = b_p // tm

    x2 = x.reshape(B, -1)
    x2 = jnp.pad(x2, ((0, b_p - B), (0, d_in_p - d_in))).astype(compute_dtype)

    def pad_w(w, rows, cols):
        return jnp.pad(w, ((0, rows - w.shape[0]),
                           (0, cols - w.shape[1]))).astype(compute_dtype)

    def pad_b(b, cols):
        return jnp.pad(b, (0, cols - b.shape[0])).reshape(1, cols).astype(jnp.float32)

    w1p, b1p = pad_w(w1, d_in_p, h1_p), pad_b(b1, h1_p)
    w2p, b2p = pad_w(w2, h1_p, h2_p), pad_b(b2, h2_p)
    w3p, b3p = pad_w(w3, h2_p, out_p), pad_b(b3, out_p)

    def mode_of(p):
        p = float(p)
        if (not training) or p <= 0.0:
            return "none", 0, 1.0
        if p >= 1.0:
            return "zero", 0, 0.0
        return "mask", int(p * (1 << 32)), 1.0 / (1.0 - p)

    mode1, thresh1, inv1 = mode_of(dropout1)
    mode2, thresh2, inv2 = mode_of(dropout2)

    # Per-element uint32 random bits; each batch tile automatically gets its
    # own independent slice (no PRNG re-seeding-per-tile pitfall).
    key = jax.random.PRNGKey(seed)
    k1, k2 = jax.random.split(key)
    bits1 = jax.random.bits(k1, (b_p, h1_p), dtype=jnp.uint32)
    bits2 = jax.random.bits(k2, (b_p, h2_p), dtype=jnp.uint32)

    kernel = functools.partial(
        _mlp_kernel,
        mode1=mode1, thresh1=thresh1, inv1=inv1,
        mode2=mode2, thresh2=thresh2, inv2=inv2,
    )

    def tile_spec(cols):                   # batch-tiled arrays (x, bits, out)
        return pl.BlockSpec((tm, cols), lambda i: (i, 0))

    def resident_spec(shape):              # weights/biases: stay VMEM-resident
        return pl.BlockSpec(shape, lambda i: (0, 0))

    out = pl.pallas_call(
        kernel,
        out_shape=jax.ShapeDtypeStruct((b_p, out_p), jnp.float32),
        grid=(num_tiles,),
        in_specs=[
            tile_spec(d_in_p),
            resident_spec((d_in_p, h1_p)), resident_spec((1, h1_p)),
            resident_spec((h1_p, h2_p)),   resident_spec((1, h2_p)),
            resident_spec((h2_p, out_p)),  resident_spec((1, out_p)),
            tile_spec(h1_p), tile_spec(h2_p),
        ],
        out_specs=tile_spec(out_p),
        compiler_params=pltpu.CompilerParams(
            dimension_semantics=("parallel",),
            vmem_limit_bytes=48 * 1024 * 1024,
        ),
    )(x2, w1p, b1p, w2p, b2p, w3p, b3p, bits1, bits2)

    return out[:B, :out_dim]


def init_params(key, input_size, num_hiddens1, num_hiddens2, output_size):
    """Deterministic init mimicking nn.Linear (uniform +-1/sqrt(fan_in))."""
    def linear(k, fan_in, fan_out):
        kw, kb = jax.random.split(k)
        bound = 1.0 / (fan_in ** 0.5)
        w = jax.random.uniform(kw, (fan_in, fan_out), jnp.float32, -bound, bound)
        b = jax.random.uniform(kb, (fan_out,), jnp.float32, -bound, bound)
        return w, b

    k1, k2, k3 = jax.random.split(key, 3)
    w1, b1 = linear(k1, input_size, num_hiddens1)
    w2, b2 = linear(k2, num_hiddens1, num_hiddens2)
    w3, b3 = linear(k3, num_hiddens2, output_size)
    return (w1, b1, w2, b2, w3, b3)


def _reference_eval(x, params, compute_dtype=jnp.bfloat16):
    """Pure-JAX eval-mode reference with the same bf16 weight cast."""
    w1, b1, w2, b2, w3, b3 = params
    xf = x.reshape(x.shape[0], -1).astype(compute_dtype)
    h1 = jnp.maximum(
        jnp.dot(xf, w1.astype(compute_dtype), preferred_element_type=jnp.float32) + b1, 0.0)
    h2 = jnp.maximum(
        jnp.dot(h1.astype(compute_dtype), w2.astype(compute_dtype),
                preferred_element_type=jnp.float32) + b2, 0.0)
    return (jnp.dot(h2.astype(compute_dtype), w3.astype(compute_dtype),
                    preferred_element_type=jnp.float32) + b3)


if __name__ == "__main__":
    # Shapes consistent with the module's forward: x [B, C, H, W] -> flatten.
    B, C, H, W = 8, 1, 16, 16
    input_size = C * H * W            # 256
    num_hiddens1 = 128
    num_hiddens2 = 64
    output_size = 32
    dropout1, dropout2 = 0.5, 0.3

    key = jax.random.PRNGKey(0)
    kx, kp = jax.random.split(key)
    x = jax.random.normal(kx, (B, C, H, W), dtype=jnp.float32)
    params = init_params(kp, input_size, num_hiddens1, num_hiddens2, output_size)

    # Training mode (dropout active).
    out_train = dropout_mlp_forward(
        x, params, dropout1=dropout1, dropout2=dropout2, training=True, seed=1234)
    out_train = jax.block_until_ready(out_train)
    assert out_train.shape == (B, output_size), out_train.shape
    assert bool(jnp.all(jnp.isfinite(out_train)))

    # Eval mode (no dropout) — compare against a pure-JAX reference.
    out_eval = dropout_mlp_forward(
        x, params, dropout1=dropout1, dropout2=dropout2, training=False, seed=0)
    out_eval = jax.block_until_ready(out_eval)
    ref = _reference_eval(x, params)
    assert out_eval.shape == (B, output_size), out_eval.shape
    assert bool(jnp.allclose(out_eval, ref, atol=1e-2, rtol=1e-2))

    print("KERNEL_OK")
</pallas_src>

<mosaic_0001>
module attributes {stable_mosaic.version = 11 : i64} {
  func.func @_mlp_kernel(%arg0: i32, %arg1: memref<8x256xbf16, #tpu.memory_space<vmem>>, %arg2: memref<256x128xbf16, #tpu.memory_space<vmem>>, %arg3: memref<1x128xf32, #tpu.memory_space<vmem>>, %arg4: memref<128x128xbf16, #tpu.memory_space<vmem>>, %arg5: memref<1x128xf32, #tpu.memory_space<vmem>>, %arg6: memref<128x128xbf16, #tpu.memory_space<vmem>>, %arg7: memref<1x128xf32, #tpu.memory_space<vmem>>, %arg8: memref<8x128xi32, #tpu.memory_space<vmem>>, %arg9: memref<8x128xi32, #tpu.memory_space<vmem>>, %arg10: memref<8x128xf32, #tpu.memory_space<vmem>>) attributes {dimension_semantics = [#tpu.dimension_semantics<parallel>], iteration_bounds = array<i64: 1>, scalar_prefetch = 0 : i64, scratch_operands = 0 : i64, tpu.core_type = #tpu.core_type<tc>, window_params = [{transform_indices = @transform_0, window_bounds = array<i64: 8, 256>}, {pipeline_mode = #tpu.pipeline_mode<synchronous>, transform_indices = @transform_1, window_bounds = array<i64: 256, 128>}, {pipeline_mode = #tpu.pipeline_mode<synchronous>, transform_indices = @transform_2, window_bounds = array<i64: 1, 128>}, {pipeline_mode = #tpu.pipeline_mode<synchronous>, transform_indices = @transform_3, window_bounds = array<i64: 128, 128>}, {pipeline_mode = #tpu.pipeline_mode<synchronous>, transform_indices = @transform_4, window_bounds = array<i64: 1, 128>}, {pipeline_mode = #tpu.pipeline_mode<synchronous>, transform_indices = @transform_5, window_bounds = array<i64: 128, 128>}, {pipeline_mode = #tpu.pipeline_mode<synchronous>, transform_indices = @transform_6, window_bounds = array<i64: 1, 128>}, {transform_indices = @transform_7, window_bounds = array<i64: 8, 128>}, {transform_indices = @transform_8, window_bounds = array<i64: 8, 128>}, {transform_indices = @transform_9, window_bounds = array<i64: 8, 128>}]} {
    %c0 = arith.constant 0 : index
    %c0_0 = arith.constant 0 : index
    %0 = vector.load %arg1[%c0, %c0_0] : memref<8x256xbf16, #tpu.memory_space<vmem>>, vector<8x256xbf16>
    %c0_1 = arith.constant 0 : index
    %c0_2 = arith.constant 0 : index
    %1 = vector.load %arg2[%c0_1, %c0_2] : memref<256x128xbf16, #tpu.memory_space<vmem>>, vector<256x128xbf16>
    %cst = arith.constant dense<0.000000e+00> : vector<8x128xf32>
    %2 = tpu.matmul %0, %1, %cst {dimension_numbers = #tpu.dot_dimension_numbers<[1], [0], [0], [1], [0, 0, 1, 1], [], []>} : vector<8x256xbf16>, vector<256x128xbf16>, vector<8x128xf32> -> vector<8x128xf32>
    %c0_3 = arith.constant 0 : index
    %c0_4 = arith.constant 0 : index
    %3 = vector.load %arg3[%c0_3, %c0_4] : memref<1x128xf32, #tpu.memory_space<vmem>>, vector<1x128xf32>
    %4 = vector.broadcast %3 : vector<1x128xf32> to vector<8x128xf32>
    %5 = arith.addf %2, %4 : vector<8x128xf32>
    %cst_5 = arith.constant 0.000000e+00 : f32
    %6 = vector.broadcast %cst_5 : f32 to vector<8x128xf32>
    %7 = arith.maximumf %5, %6 : vector<8x128xf32>
    %c0_6 = arith.constant 0 : index
    %c0_7 = arith.constant 0 : index
    %8 = vector.load %arg8[%c0_6, %c0_7] : memref<8x128xi32, #tpu.memory_space<vmem>>, vector<8x128xi32>
    %c-2147483648_i32 = arith.constant -2147483648 : i32
    %9 = vector.broadcast %c-2147483648_i32 : i32 to vector<8x128xi32>
    %10 = arith.cmpi ugt, %8, %9 : vector<8x128xi32>
    %cst_8 = arith.constant 2.000000e+00 : f32
    %11 = vector.broadcast %cst_8 : f32 to vector<8x128xf32>
    %12 = arith.mulf %7, %11 : vector<8x128xf32>
    %cst_9 = arith.constant 0.000000e+00 : f32
    %13 = vector.broadcast %cst_9 : f32 to vector<8x128xf32>
    %14 = arith.select %10, %12, %13 : vector<8x128xi1>, vector<8x128xf32>
    %15 = arith.truncf %14 : vector<8x128xf32> to vector<8x128xbf16>
    %c0_10 = arith.constant 0 : index
    %c0_11 = arith.constant 0 : index
    %16 = vector.load %arg4[%c0_10, %c0_11] : memref<128x128xbf16, #tpu.memory_space<vmem>>, vector<128x128xbf16>
    %cst_12 = arith.constant dense<0.000000e+00> : vector<8x128xf32>
    %17 = tpu.matmul %15, %16, %cst_12 {dimension_numbers = #tpu.dot_dimension_numbers<[1], [0], [0], [1], [0, 0, 1, 1], [], []>} : vector<8x128xbf16>, vector<128x128xbf16>, vector<8x128xf32> -> vector<8x128xf32>
    %c0_13 = arith.constant 0 : index
    %c0_14 = arith.constant 0 : index
    %18 = vector.load %arg5[%c0_13, %c0_14] : memref<1x128xf32, #tpu.memory_space<vmem>>, vector<1x128xf32>
    %19 = vector.broadcast %18 : vector<1x128xf32> to vector<8x128xf32>
    %20 = arith.addf %17, %19 : vector<8x128xf32>
    %cst_15 = arith.constant 0.000000e+00 : f32
    %21 = vector.broadcast %cst_15 : f32 to vector<8x128xf32>
    %22 = arith.maximumf %20, %21 : vector<8x128xf32>
    %c0_16 = arith.constant 0 : index
    %c0_17 = arith.constant 0 : index
    %23 = vector.load %arg9[%c0_16, %c0_17] : memref<8x128xi32, #tpu.memory_space<vmem>>, vector<8x128xi32>
    %c1288490188_i32 = arith.constant 1288490188 : i32
    %24 = vector.broadcast %c1288490188_i32 : i32 to vector<8x128xi32>
    %25 = arith.cmpi ugt, %23, %24 : vector<8x128xi32>
    %cst_18 = arith.constant 1.42857146 : f32
    %26 = vector.broadcast %cst_18 : f32 to vector<8x128xf32>
    %27 = arith.mulf %22, %26 : vector<8x128xf32>
    %cst_19 = arith.constant 0.000000e+00 : f32
    %28 = vector.broadcast %cst_19 : f32 to vector<8x128xf32>
    %29 = arith.select %25, %27, %28 : vector<8x128xi1>, vector<8x128xf32>
    %30 = arith.truncf %29 : vector<8x128xf32> to vector<8x128xbf16>
    %c0_20 = arith.constant 0 : index
    %c0_21 = arith.constant 0 : index
    %31 = vector.load %arg6[%c0_20, %c0_21] : memref<128x128xbf16, #tpu.memory_space<vmem>>, vector<128x128xbf16>
    %cst_22 = arith.constant dense<0.000000e+00> : vector<8x128xf32>
    %32 = tpu.matmul %30, %31, %cst_22 {dimension_numbers = #tpu.dot_dimension_numbers<[1], [0], [0], [1], [0, 0, 1, 1], [], []>} : vector<8x128xbf16>, vector<128x128xbf16>, vector<8x128xf32> -> vector<8x128xf32>
    %c0_23 = arith.constant 0 : index
    %c0_24 = arith.constant 0 : index
    %33 = vector.load %arg7[%c0_23, %c0_24] : memref<1x128xf32, #tpu.memory_space<vmem>>, vector<1x128xf32>
    %34 = vector.broadcast %33 : vector<1x128xf32> to vector<8x128xf32>
    %35 = arith.addf %32, %34 : vector<8x128xf32>
    %c0_25 = arith.constant 0 : index
    %c0_26 = arith.constant 0 : index
    %36 = vector.load %arg10[%c0_25, %c0_26] : memref<8x128xf32, #tpu.memory_space<vmem>>, vector<8x128xf32>
    tpu.vector_store %arg10[%c0_25, %c0_26], %35 {strides = array<i32>} : memref<8x128xf32, #tpu.memory_space<vmem>>, vector<8x128xf32>,
    return
  }
  func.func @transform_0(%arg0: i32) -> (i32, i32) {
    %c0_i32 = arith.constant 0 : i32
    %c0_i32_0 = arith.constant 0 : i32
    return %arg0, %c0_i32 : i32, i32
  }
  func.func @transform_1(%arg0: i32) -> (i32, i32) {
    %c0_i32 = arith.constant 0 : i32
    %c0_i32_0 = arith.constant 0 : i32
    %c0_i32_1 = arith.constant 0 : i32
    return %c0_i32, %c0_i32_0 : i32, i32
  }
  func.func @transform_2(%arg0: i32) -> (i32, i32) {
    %c0_i32 = arith.constant 0 : i32
    %c0_i32_0 = arith.constant 0 : i32
    %c0_i32_1 = arith.constant 0 : i32
    return %c0_i32, %c0_i32_0 : i32, i32
  }
  func.func @transform_3(%arg0: i32) -> (i32, i32) {
    %c0_i32 = arith.constant 0 : i32
    %c0_i32_0 = arith.constant 0 : i32
    %c0_i32_1 = arith.constant 0 : i32
    return %c0_i32, %c0_i32_0 : i32, i32
  }
  func.func @transform_4(%arg0: i32) -> (i32, i32) {
    %c0_i32 = arith.constant 0 : i32
    %c0_i32_0 = arith.constant 0 : i32
    %c0_i32_1 = arith.constant 0 : i32
    return %c0_i32, %c0_i32_0 : i32, i32
  }
  func.func @transform_5(%arg0: i32) -> (i32, i32) {
    %c0_i32 = arith.constant 0 : i32
    %c0_i32_0 = arith.constant 0 : i32
    %c0_i32_1 = arith.constant 0 : i32
    return %c0_i32, %c0_i32_0 : i32, i32
  }
  func.func @transform_6(%arg0: i32) -> (i32, i32) {
    %c0_i32 = arith.constant 0 : i32
    %c0_i32_0 = arith.constant 0 : i32
    %c0_i32_1 = arith.constant 0 : i32
    return %c0_i32, %c0_i32_0 : i32, i32
  }
  func.func @transform_7(%arg0: i32) -> (i32, i32) {
    %c0_i32 = arith.constant 0 : i32
    %c0_i32_0 = arith.constant 0 : i32
    return %arg0, %c0_i32 : i32, i32
  }
  func.func @transform_8(%arg0: i32) -> (i32, i32) {
    %c0_i32 = arith.constant 0 : i32
    %c0_i32_0 = arith.constant 0 : i32
    return %arg0, %c0_i32 : i32, i32
  }
  func.func @transform_9(%arg0: i32) -> (i32, i32) {
    %c0_i32 = arith.constant 0 : i32
    %c0_i32_0 = arith.constant 0 : i32
    return %arg0, %c0_i32 : i32, i32
  }
}

</mosaic_0001>

<bundles_post_ra>
// kernel: tpu_custom_call.1
= control target key start
LH: loop header
LB: loop body
LE: loop exit
PB: predicated region body
PF: predicated region fallthrough
CT: control target
= control target key end

     0   :  { %14 = vsyncpa [#allocation3], 0  ;;  %s933_s0 = inlined_call_operand.hbm [shape: bf16[8,256], index: 0, kind: input, shape index: {}]   ;;  %s934_s1 = inlined_call_operand.hbm [shape: bf16[256,128], index: 1, kind: input, shape index: {}]   ;;  %s935_s2 = inlined_call_operand.vmem [shape: f32[1,128], index: 2, kind: input, shape index: {}]   ;;  %s936_s3 = inlined_call_operand.hbm [shape: bf16[128,128], index: 3, kind: input, shape index: {}]   ;;  %s937_s4 = inlined_call_operand.vmem [shape: f32[1,128], index: 4, kind: input, shape index: {}]   ;;  %s938_s5 = inlined_call_operand.hbm [shape: bf16[128,128], index: 5, kind: input, shape index: {}]   ;;  %s939_s6 = inlined_call_operand.vmem [shape: f32[1,128], index: 6, kind: input, shape index: {}]   ;;  %s940_s7 = inlined_call_operand.hbm [shape: u32[8,128], index: 7, kind: input, shape index: {}]   ;;  %s941_s8 = inlined_call_operand.hbm [shape: u32[8,128], index: 8, kind: input, shape index: {}]   ;;  %s942_s9 = inlined_call_operand.hbm [shape: f32[8,128], index: 9, kind: output, shape index: {}]  }
   0x1   :  { %15 = vsyncpa [#allocation6], 0 }
   0x2   :  { %16 = vsyncpa [#allocation9], 0 }
   0x3   :  { %17 = vsyncpa [#allocation12], 0  ;;  %s34_s11 = sshll.u32 %s934_s1, 4  ;;  %s35_s11 = int_to_ptr.hbm [resolvable:$true] %s34_s11 }
   0x4   :  { %18 = vsyncpa [#allocation4], 0  ;;  %s844_s12 = smov [#allocation5]   ;;  %s64_s16 = sshll.u32 %s938_s5, 4  ;;  %s65_s16 = int_to_ptr.hbm [resolvable:$true] %s64_s16 }
   0x5   :  { %s36_s13 = sshll.u32 %s844_s12, 4  ;;  %s845_s17 = smov 64   ;;  %s37_s13 = int_to_ptr.vmem [resolvable:$true] %s36_s13 }
   0x6   :  { %s846_s18 = smov 4   ;;  %s847_s19 = smov [#allocation8]  }
   0x7   :  { %42 = dma.hbm_to_vmem [thread:$0]  %s35_s11, 2048, %s37_s13, [#allocation6], %s845_s17, %s845_s17, %s846_s18  }
   0x8   :  { %s66_s20 = sshll.u32 %s847_s19, 4  ;;  %s24_s23 = sshll.u32 %s933_s0, 4  ;;  %s67_s20 = int_to_ptr.vmem [resolvable:$true] %s66_s20  ;;  %s25_s23 = int_to_ptr.hbm [resolvable:$true] %s24_s23 }
   0x9   :  { %72 = dma.hbm_to_vmem [thread:$0]  %s65_s16, 1024, %s67_s20, [#allocation9], %s845_s17, %s845_s17, %s846_s18  }
   0xa   :  { %s49_s25 = sshll.u32 %s936_s3, 4  ;;  %s848_s26 = smov [#allocation2]   ;;  %s50_s25 = int_to_ptr.hbm [resolvable:$true] %s49_s25 }
   0xb   :  { %s26_s27 = sshll.u32 %s848_s26, 4  ;;  %s849_s5 = smov [#allocation7]   ;;  %s27_s27 = int_to_ptr.vmem [resolvable:$true] %s26_s27 }
   0xc   :  { %29 = dma.hbm_to_vmem [thread:$0]  %s25_s23, 128, %s27_s27, [#allocation3]  }
   0xd   :  { %s51_s28 = sshll.u32 %s849_s5, 4  ;;  %s80_s10 = sshll.u32 %s940_s7, 4  ;;  %s52_s28 = int_to_ptr.vmem [resolvable:$true] %s51_s28  ;;  %s81_s10 = int_to_ptr.hbm [resolvable:$true] %s80_s10 }
   0xe   :  { %57 = dma.hbm_to_vmem [thread:$0]  %s50_s25, 1024, %s52_s28, [#allocation6], %s845_s17, %s845_s17, %s846_s18  }
   0xf   :  { %s91_s12 = sshll.u32 %s941_s8, 4  ;;  %s850_s13 = smov [#allocation10]   ;;  %s92_s12 = int_to_ptr.hbm [resolvable:$true] %s91_s12 }
  0x10   :  { %s82_s3 = sshll.u32 %s850_s13, 4  ;;  %s851_s14 = smov [#allocation11]   ;;  %s83_s3 = int_to_ptr.vmem [resolvable:$true] %s82_s3 }
  0x11   :  { %85 = dma.hbm_to_vmem [thread:$0]  %s81_s10, 128, %s83_s3, [#allocation9]  }
  0x12   :  { %s93_s15 = sshll.u32 %s851_s14, 4  ;;  %s94_s15 = int_to_ptr.vmem [resolvable:$true] %s93_s15 }
  0x13   :  { %96 = dma.hbm_to_vmem [thread:$0]  %s92_s12, 128, %s94_s15, [#allocation12]  }
  0x14   :  { %834 = dma.done.wait [#allocation3], 128  }
  0x15   :  { %835 = vsyncadd [#allocation3], 4294967168 }
  0x16   :  { %836 = dma.done.wait [#allocation6], 3072  }
  0x17   :  { %837 = vsyncadd [#allocation6], 4294964224 }
  0x18   :  { %838 = dma.done.wait [#allocation9], 1152  }
  0x19   :  { %839 = vsyncadd [#allocation9], 4294966144 }
  0x1a   :  { %840 = dma.done.wait [#allocation12], 128  }
  0x1b   :  { %841 = vsyncadd [#allocation12], 4294967168  ;;  %v629_v0 = vld [vmem:[#allocation5 + $0x38] sm:$0xff]  ;;  %v628_v2 = vld [vmem:[#allocation5 + $0x30] sm:$0xff]  ;;  %s852_s19 = smov [#allocation13]  }
  0x1c   :  { %v637_v1 = vld [vmem:[#allocation5 + $0x78] sm:$0xff]  ;;  %261 = vmatpush.bf16.msra.mxu0 %v629_v0  ;;  %v636_v3 = vld [vmem:[#allocation5 + $0x70] sm:$0xff]  ;;  %v627_v5 = vld [vmem:[#allocation5 + $0x28] sm:$0xff]  ;;  %s471_s20 = sshll.u32 %s852_s19, 4  ;;  %s472_s20 = int_to_ptr.vmem [resolvable:$true] %s471_s20 }
  0x1d   :  { %274 = vmatpush.bf16.msra.mxu1 %v637_v1  ;;  %v645_v4 = vld [vmem:[#allocation7 + $0x38] sm:$0xff]  ;;  %v635_v6 = vld [vmem:[#allocation5 + $0x68] sm:$0xff]  ;;  %v644_v7 = vld [vmem:[#allocation7 + $0x30] sm:$0xff] }
  0x1e   :  { %363 = vmatpush.bf16.msra.mxu2 %v645_v4  ;;  %v626_v8 = vld [vmem:[#allocation5 + $0x20] sm:$0xff]  ;;  %v643_v10 = vld [vmem:[#allocation7 + $0x28] sm:$0xff]  ;;  %v625_v11 = vld [vmem:[#allocation5 + $0x18] sm:$0xff] }
  0x1f   :  { %v634_v9 = vld [vmem:[#allocation5 + $0x60] sm:$0xff]  ;;  %v633_v12 = vld [vmem:[#allocation5 + $0x58] sm:$0xff]  ;;  %v624_v14 = vld [vmem:[#allocation5 + $0x10] sm:$0xff] }
  0x20   :  { %262 = vmatpush.bf16.msra.mxu0 %v628_v2  ;;  %v642_v13 = vld [vmem:[#allocation7 + $0x20] sm:$0xff]  ;;  %v632_v15 = vld [vmem:[#allocation5 + $0x50] sm:$0xff]  ;;  %v641_v16 = vld [vmem:[#allocation7 + $0x18] sm:$0xff] }
  0x21   :  { %275 = vmatpush.bf16.msra.mxu1 %v636_v3  ;;  %v623_v17 = vld [vmem:[#allocation5 + $0x8] sm:$0xff]  ;;  %v121_v19 = vld [vmem:[#allocation2] sm:$0xff]  ;;  %v622_v22 = vld [vmem:[#allocation5] sm:$0xff] }
  0x22   :  { %364 = vmatpush.bf16.msra.mxu2 %v644_v7  ;;  %v631_v18 = vld [vmem:[#allocation5 + $0x48] sm:$0xff]  ;;  %v159_v20 = vunpack.c.l.b16 %v121_v19  ;;  %v160_v21 = vunpack.c.h.b16 %v121_v19  ;;  %v630_v23 = vld [vmem:[#allocation5 + $0x40] sm:$0xff]  ;;  %v640_v26 = vld [vmem:[#allocation7 + $0x10] sm:$0xff] }
  0x23   :  { %v639_v27 = vld [vmem:[#allocation7 + $0x8] sm:$0xff]  ;;  %v638_v28 = vld [vmem:[#allocation7] sm:$0xff]  ;;  %v653_v29 = vld [vmem:[#allocation8 + $0x38] sm:$0xff] }
  0x24   :  { %263 = vmatpush.bf16.msra.mxu0 %v627_v5  ;;  %v161_v24 = vpack.c.b16 %v159_v20, %v159_v20  ;;  %v162_v25 = vpack.c.b16 %v160_v21, %v160_v21  ;;  %452 = vmatpush.bf16.msra.mxu3 %v653_v29  ;;  %v652_v30 = vld [vmem:[#allocation8 + $0x30] sm:$0xff]  ;;  %v651_v31 = vld [vmem:[#allocation8 + $0x28] sm:$0xff]  ;;  %v650_v32 = vld [vmem:[#allocation8 + $0x20] sm:$0xff] }
  0x25   :  { %276 = vmatpush.bf16.msra.mxu1 %v635_v6  ;;  %v649_v33 = vld [vmem:[#allocation8 + $0x18] sm:$0xff]  ;;  %v648_v35 = vld [vmem:[#allocation8 + $0x10] sm:$0xff]  ;;  %v288_v36 = vld [vmem:[#allocation10] sm:$0xff] }
  0x26   :  { %365 = vmatpush.bf16.msra.mxu2 %v643_v10  ;;  %v663_v34 = vld [vmem:[%s935_s2] ss:$0 sm:$0xff]  ;;  %v550_v40 = vxor.u32 2147483648, %v288_v36  ;;  %v647_v47 = vld [vmem:[#allocation8 + $0x8] sm:$0xff]  ;;  %v646_v48 = vld [vmem:[#allocation8] sm:$0xff] }
  0x27   :  { %v377_v49 = vld [vmem:[#allocation11] sm:$0xff]  ;;  %v664_v50 = vld [vmem:[%s937_s4] ss:$0 sm:$0xff]  ;;  %s473_s4 = sshll.u32 %s942_s9, 4  ;;  %s474_s4 = int_to_ptr.hbm [resolvable:$true] %s473_s4 }
  0x28   :  { %264 = vmatpush.bf16.msra.mxu0 %v626_v8  ;;  %453 = vmatpush.bf16.msra.mxu3 %v652_v30  ;;  %vm291_vm0 = vcmp.gt.s32.totalorder %v550_v40, 0  ;;  %v586_v51 = vxor.u32 2147483648, %v377_v49  ;;  %v665_v58 = vld [vmem:[%s939_s6] ss:$0 sm:$0xff] }
  0x29   :  { %277 = vmatpush.bf16.msra.mxu1 %v634_v9  ;;  %vm583_vm1 = vmpackc.low %vm291_vm0, %vm291_vm0 }
  0x2a   :  { %366 = vmatpush.bf16.msra.mxu2 %v642_v13  ;;  %vm380_vm2 = vcmp.gt.s32.totalorder %v586_v51, 3435973836 }
  0x2b   :  { %vm619_vm3 = vmpackc.low %vm380_vm2, %vm380_vm2 }
  0x2c   :  { %265 = vmatpush.bf16.msra.mxu0 %v625_v11  ;;  %454 = vmatpush.bf16.msra.mxu3 %v651_v31 }
  0x2d   :  { %278 = vmatpush.bf16.msra.mxu1 %v633_v12 }
  0x2e   :  { %367 = vmatpush.bf16.msra.mxu2 %v641_v16 }
  0x30   :  { %266 = vmatpush.bf16.msra.mxu0 %v624_v14  ;;  %455 = vmatpush.bf16.msra.mxu3 %v650_v32 }
  0x31   :  { %279 = vmatpush.bf16.msra.mxu1 %v632_v15 }
  0x32   :  { %368 = vmatpush.bf16.msra.mxu2 %v640_v26 }
  0x34   :  { %267 = vmatpush.bf16.msra.mxu0 %v623_v17  ;;  %456 = vmatpush.bf16.msra.mxu3 %v649_v33 }
  0x35   :  { %280 = vmatpush.bf16.msra.mxu1 %v631_v18 }
  0x36   :  { %369 = vmatpush.bf16.msra.mxu2 %v639_v27 }
  0x38   :  { %268 = vmatpush.bf16.msra.mxu0 %v622_v22  ;;  %457 = vmatpush.bf16.msra.mxu3 %v648_v35 }
  0x39   :  { %281 = vmatpush.bf16.msra.mxu1 %v630_v23 }
  0x3a   :  { %370 = vmatpush.bf16.msra.mxu2 %v638_v28 }
  0x3b   :  { %269 = vmatmul.bf16.vlgmr.msra.gmra.mxu0 %v161_v24 }
  0x3c   :  { %282 = vmatmul.bf16.vlgmr.msra.gmra.mxu1 %v162_v25  ;;  %458 = vmatpush.bf16.msra.mxu3 %v647_v47 }
  0x40   :  { %459 = vmatpush.bf16.msra.mxu3 %v646_v48 }
  0xb8   :  { %v270_v37 = vpop.f32.mrf.mxu0 }
  0xb9   :  { %v283_v38 = vpop.f32.mrf.mxu1  ;;  %v271_v39 = vadd.f32 %v663_v34, %v270_v37 }
  0xbb   :  { %v284_v41 = vadd.f32 %v283_v38, %v271_v39 }
  0xbd   :  { %v287_v42 = vmax.f32 %v284_v41, 0.0 }
  0xbf   :  { %v292_v43 = vmul.f32 2.0, %v287_v42 }
  0xc0   :  { %v272_v44 = vpop.f32.mrf.mxu0 }
  0xc1   :  { %v285_v45 = vpop.f32.mrf.mxu1  ;;  %v584_v46 = vpack.c.bf16 %v292_v43, %v292_v43 }
  0xc3   :  { %585 = vmatmul.msk.bf16.vlgmr.msra.gmra.mxu2 %vm583_vm1, %v584_v46 }
 0x146   :  { %v372_v52 = vpop.f32.mrf.mxu2 }
 0x147   :  { %v373_v53 = vadd.f32 %v664_v50, %v372_v52 }
 0x149   :  { %v376_v54 = vmax.f32 %v373_v53, 0.0 }
 0x14b   :  { %v381_v55 = vmul.f32 1.4285715, %v376_v54 }
 0x14d   :  { %v620_v56 = vpack.c.bf16 %v381_v55, %v381_v55 }
 0x14e   :  { %v374_v57 = vpop.f32.mrf.mxu2 }
 0x14f   :  { %621 = vmatmul.msk.bf16.vlgmr.msra.gmra.mxu3 %vm619_vm3, %v620_v56 }
 0x1d2   :  { %v461_v59 = vpop.f32.mrf.mxu3 }
 0x1d3   :  { %v462_v60 = vadd.f32 %v665_v58, %v461_v59 }
 0x1d5   :  { %465 = vst [vmem:[#allocation13] sm:$0xff] %v462_v60 }
 0x1d6   :  { %476 = dma.vmem_to_hbm [thread:$0]  %s472_s20, 128, %s474_s4, [#allocation4]  }
 0x1da   :  { %v463_v61 = vpop.f32.mrf.mxu3 }
 0x1db   :  { %842 = dma.done.wait [#allocation4], 128  }
 0x1dc   :  { %843 = vsyncadd [#allocation4], 4294967168 }
 0x1dd   :  { %481 = vsyncpa [#allocation3], 1 }
 0x1de   :  { %482 = vsyncpa [#allocation6], 1 }
 0x1df   :  { %483 = vsyncpa [#allocation9], 1 }
 0x1e0   :  { %484 = vsyncpa [#allocation12], 1 }
 0x1e1   :  { %485 = vsyncpa [#allocation4], 1 }

</bundles_post_ra>
